<compile_context>
chip_gen: v5e
topology: v5e:2x2
jax: 0.10.0
libtpu: 0.0.40
codegen_flags: <defaults>
</compile_context>

<pallas_src>
import numpy as np
import jax
import jax.numpy as jnp
from jax.experimental import pallas as pl
from jax.experimental.pallas import tpu as pltpu


# ---------------------------------------------------------------------------
# ramps.log_rampup (scalar, host-side glue — matches the CCT `ramps` module)
# ---------------------------------------------------------------------------
def log_rampup(current, rampup_length):
    if rampup_length == 0:
        return 1.0
    current = float(np.clip(current, 0.0, rampup_length))
    return float(1.0 - np.exp(-5.0 * current / rampup_length))


_RAMPS = {"log_rampup": log_rampup}

# Invalid-pixel prob sentinel: must stay above any realistic threshold (<= ~1).
_SENTINEL = 3.0e38
_VMEM_LIMIT = 48 * 1024 * 1024        # raised scoped-VMEM cap (safe on v5e..v7x)
_K1_BLOCK_BYTES = 2 * 1024 * 1024     # target f32 bytes for the logits block
_K2_BLOCK_BYTES = 2 * 1024 * 1024     # target f32 bytes per prob/loss block


def _pick_tile_h(h, w, c, budget_bytes):
    """Rows per grid step so one f32 input block is ~budget_bytes."""
    rows = budget_bytes // max(1, c * w * 4)
    if rows >= h:
        return h                       # full dim — always a legal block
    rows = max(8, (rows // 8) * 8)     # (8,128) sublane rule
    return min(rows, h)


# ---------------------------------------------------------------------------
# Kernel 1: per-pixel prob / CE loss + per-tile partial statistics
# ---------------------------------------------------------------------------
def _make_ce_kernel(ignore_index, h, tile_h, weighted):
    ragged = (h % tile_h) != 0

    def kernel(thr_ref, logits_ref, tgt_ref, *refs):
        if weighted:
            w_ref, prob_ref, loss_ref, stat_ref = refs
        else:
            prob_ref, loss_ref, stat_ref = refs

        thr = thr_ref[0]                                       # f32 in SMEM
        x = logits_ref[...].astype(jnp.float32)                # (1, C, TH, W)
        tgt = tgt_ref[...]                                     # (1, TH, W)
        num_classes = x.shape[1]

        valid = tgt != ignore_index
        if ragged:
            row = jax.lax.broadcasted_iota(jnp.int32, tgt.shape, 1)
            valid = valid & ((pl.program_id(1) * tile_h + row) < h)
        safe_tgt = jnp.where(valid, tgt, 0)

        # softmax statistics over the (major) class axis — plain VPU ops here
        m = jnp.max(x, axis=1, keepdims=True)                  # (1, 1, TH, W)
        e = jnp.exp(x - m)                                     # (1, C, TH, W)
        sum_e = jnp.sum(e, axis=1, keepdims=True)              # (1, 1, TH, W)

        cls = jax.lax.broadcasted_iota(jnp.int32, x.shape, 1)
        onehot = cls == safe_tgt[:, None, :, :]                # (1, C, TH, W)

        # reuse exp(x - m) for prob (no extra EUP exp); robust lse form for CE
        tgt_e = jnp.sum(jnp.where(onehot, e, 0.0), axis=1)         # (1, TH, W)
        tgt_logit = jnp.sum(jnp.where(onehot, x, 0.0), axis=1)     # (1, TH, W)
        prob = tgt_e / sum_e[:, 0]
        ce = (m[:, 0] + jnp.log(sum_e[:, 0])) - tgt_logit

        if weighted:
            # class-weight gather via small static unroll over SMEM scalars
            w_t = jnp.zeros(tgt.shape, jnp.float32)
            for cc in range(num_classes):
                w_t = w_t + jnp.where(safe_tgt == cc, w_ref[cc], 0.0)
            ce = ce * w_t

        prob = jnp.where(valid, prob, _SENTINEL)
        ce = jnp.where(valid, ce, 0.0)
        prob_ref[...] = prob                                   # dense (TH, W) store
        loss_ref[...] = ce

        # per-tile partials: [num_valid, cnt(prob<=thr), cnt(prob<thr), sum(loss|prob<thr)]
        lt = prob < thr                 # sentinel never passes any sane threshold
        le = prob <= thr
        nv = jnp.sum(valid.astype(jnp.float32))
        c_le = jnp.sum(le.astype(jnp.float32))
        c_lt = jnp.sum(lt.astype(jnp.float32))
        s_lt = jnp.sum(jnp.where(lt, ce, 0.0))
        lane = jax.lax.broadcasted_iota(jnp.int32, stat_ref.shape, 3)
        stat_ref[...] = (jnp.where(lane == 0, nv, 0.0)
                         + jnp.where(lane == 1, c_le, 0.0)
                         + jnp.where(lane == 2, c_lt, 0.0)
                         + jnp.where(lane == 3, s_lt, 0.0))

    return kernel


def _per_pixel_stats(logits, target, weight_vec, ignore_index, thresh, tile_h):
    n, c, h, w = logits.shape
    gh = pl.cdiv(h, tile_h)
    weighted = weight_vec is not None
    kernel = _make_ce_kernel(ignore_index, h, tile_h, weighted)

    thr = jnp.full((1,), thresh, jnp.float32)
    in_specs = [pl.BlockSpec(memory_space=pltpu.MemorySpace.SMEM),
                pl.BlockSpec((1, c, tile_h, w), lambda i, j: (i, 0, j, 0)),
                pl.BlockSpec((1, tile_h, w), lambda i, j: (i, j, 0))]
    args = [thr, logits, target]
    if weighted:
        in_specs.append(pl.BlockSpec(memory_space=pltpu.MemorySpace.SMEM))
        args.append(weight_vec)

    out_specs = [pl.BlockSpec((1, tile_h, w), lambda i, j: (i, j, 0)),
                 pl.BlockSpec((1, tile_h, w), lambda i, j: (i, j, 0)),
                 pl.BlockSpec((1, 1, 1, 128), lambda i, j: (i, j, 0, 0))]
    out_shape = (jax.ShapeDtypeStruct((n, h, w), jnp.float32),
                 jax.ShapeDtypeStruct((n, h, w), jnp.float32),   # TODO(synk): optionally bf16 loss stream
                 jax.ShapeDtypeStruct((n, gh, 1, 128), jnp.float32))

    return pl.pallas_call(
        kernel,
        grid=(n, gh),
        in_specs=in_specs,
        out_specs=out_specs,
        out_shape=out_shape,
        compiler_params=pltpu.CompilerParams(
            dimension_semantics=("parallel", "parallel"),
            vmem_limit_bytes=_VMEM_LIMIT),
    )(*args)


# ---------------------------------------------------------------------------
# Kernel 2 (rare fallback path): selection (prob < threshold) + partial sums
# ---------------------------------------------------------------------------
def _make_select_kernel(h, tile_h):
    ragged = (h % tile_h) != 0

    def kernel(thr_ref, prob_ref, loss_ref, out_ref):
        thr = thr_ref[0]
        sel = prob_ref[...] < thr                  # invalid pixels carry the sentinel
        if ragged:
            row = jax.lax.broadcasted_iota(jnp.int32, sel.shape, 1)
            sel = sel & ((pl.program_id(1) * tile_h + row) < h)
        s = jnp.sum(jnp.where(sel, loss_ref[...], 0.0))
        c = jnp.sum(sel.astype(jnp.float32))
        lane = jax.lax.broadcasted_iota(jnp.int32, out_ref.shape, 3)
        out_ref[...] = jnp.where(lane == 0, s, 0.0) + jnp.where(lane == 1, c, 0.0)

    return kernel


def _select_reduce(prob, loss, threshold, tile_h, h):
    n, _, w = prob.shape
    gh = pl.cdiv(h, tile_h)
    thr = jnp.reshape(threshold, (1,)).astype(jnp.float32)
    kernel = _make_select_kernel(h, tile_h)

    part = pl.pallas_call(
        kernel,
        grid=(n, gh),
        in_specs=[pl.BlockSpec(memory_space=pltpu.MemorySpace.SMEM),
                  pl.BlockSpec((1, tile_h, w), lambda i, j: (i, j, 0)),
                  pl.BlockSpec((1, tile_h, w), lambda i, j: (i, j, 0))],
        out_specs=pl.BlockSpec((1, 1, 1, 128), lambda i, j: (i, j, 0, 0)),
        out_shape=jax.ShapeDtypeStruct((n, gh, 1, 128), jnp.float32),
        compiler_params=pltpu.CompilerParams(
            dimension_semantics=("parallel", "parallel"),
            vmem_limit_bytes=_VMEM_LIMIT),
    )(thr, prob, loss)
    return jnp.sum(part[:, :, :, 0]), jnp.sum(part[:, :, :, 1])


# ---------------------------------------------------------------------------
# Module wrapper (mirrors torch abCE_loss)
# ---------------------------------------------------------------------------
class AbCELossPallas:
    def __init__(self, iters_per_epoch, epochs, num_classes, weight=None,
                 reduction='mean', thresh=0.7, min_kept=1, ramp_type='log_rampup'):
        self.weight = None if weight is None else np.asarray(weight, np.float32)
        self.reduction = reduction
        self.thresh = thresh
        self.min_kept = min_kept
        self.ramp_type = ramp_type
        if ramp_type is not None:
            self.rampup_func = _RAMPS[ramp_type]
            self.iters_per_epoch = iters_per_epoch
            self.num_classes = num_classes
            self.start = 1.0 / num_classes
            self.end = 0.9
            self.total_num_iters = (epochs - 0.6 * epochs) * iters_per_epoch

    def threshold(self, curr_iter, epoch):
        cur_total_iter = self.iters_per_epoch * epoch + curr_iter
        current_rampup = self.rampup_func(cur_total_iter, self.total_num_iters)
        return current_rampup * (self.end - self.start) + self.start

    def forward(self, predict, target, ignore_index, curr_iter, epoch):
        predict = jnp.asarray(predict)
        target = jnp.asarray(target).astype(jnp.int32)
        n, c, h, w = predict.shape
        ignore_index = int(ignore_index)
        batch_kept = int(self.min_kept) * int(n)

        if self.ramp_type is not None:
            thresh = float(self.threshold(curr_iter=curr_iter, epoch=epoch))
        else:
            thresh = float(self.thresh)

        weight_vec = (None if self.weight is None
                      else jnp.asarray(self.weight, jnp.float32).reshape(c))

        tile_h1 = _pick_tile_h(h, w, c, _K1_BLOCK_BYTES)
        prob, loss, stats = _per_pixel_stats(predict, target, weight_vec,
                                             ignore_index, thresh, tile_h1)

        # tiny host-side reduction of per-tile partials (exact integer counts)
        cnt = jnp.sum(stats[:, :, :, 0:3].astype(jnp.int32), axis=(0, 1, 2))
        nv, c_le, c_lt = cnt[0], cnt[1], cnt[2]
        s_lt = jnp.sum(stats[:, :, :, 3])

        k_idx = jnp.minimum(jnp.int32(batch_kept), jnp.maximum(nv - 1, 0))
        # The k-th smallest valid prob can only exceed `thresh` when fewer than
        # k_idx+1 valid pixels have prob <= thresh; only then do we need the exact
        # order statistic (and a second selection pass).
        need_kth = jnp.logical_and(nv > 0, c_le < k_idx + 1)

        total = n * h * w
        kk = int(max(1, min(batch_kept + 1, total)))
        tile_h2 = _pick_tile_h(h, w, 1, _K2_BLOCK_BYTES)

        def _bootstrap_path(ops):
            # TODO(synk): a histogram / radix-select kernel could replace this exact
            # top_k if this rare path ever shows up in profiles.
            prob_a, loss_a = ops
            neg_top, _ = jax.lax.top_k(-prob_a.reshape(-1), kk)
            smallest = -neg_top                                   # ascending probs
            qk = smallest[jnp.clip(k_idx, 0, kk - 1)]
            threshold = jnp.maximum(qk, jnp.float32(thresh))
            return _select_reduce(prob_a, loss_a, threshold, tile_h2, h)

        def _annealed_path(ops):
            del ops
            return s_lt, c_lt.astype(jnp.float32)

        loss_sum, count = jax.lax.cond(need_kth, _bootstrap_path, _annealed_path,
                                       (prob, loss))

        if self.reduction == 'sum':
            return loss_sum
        elif self.reduction == 'mean':
            return jnp.where(count > 0, loss_sum / count, jnp.float32(0.0))
        else:
            raise NotImplementedError('Reduction Error!')


# ---------------------------------------------------------------------------
# Pure-JAX reference (mirrors torch semantics) for the correctness check
# ---------------------------------------------------------------------------
def reference_abce(predict, target, ignore_index, batch_kept, thresh,
                   weight=None, reduction='mean'):
    n, c, h, w = predict.shape
    logits = jnp.transpose(predict, (0, 2, 3, 1)).reshape(-1, c).astype(jnp.float32)
    tgt = target.reshape(-1).astype(jnp.int32)
    valid = tgt != ignore_index
    safe = jnp.where(valid, tgt, 0)
    m = jnp.max(logits, axis=-1, keepdims=True)
    lse = m + jnp.log(jnp.sum(jnp.exp(logits - m), axis=-1, keepdims=True))
    tgt_logit = jnp.take_along_axis(logits, safe[:, None], axis=-1)
    prob = jnp.exp(tgt_logit - lse)[:, 0]
    wvec = jnp.ones((c,), jnp.float32) if weight is None else jnp.asarray(weight, jnp.float32)
    loss = (lse - tgt_logit)[:, 0] * wvec[safe]
    nv = jnp.sum(valid.astype(jnp.int32))
    sp = jnp.sort(jnp.where(valid, prob, jnp.inf))
    k = jnp.clip(jnp.minimum(batch_kept, nv - 1), 0, prob.shape[0] - 1)
    min_thr = jnp.where(nv > 0, jnp.take(sp, k), jnp.float32(0.0))
    thr = jnp.maximum(min_thr, jnp.float32(thresh))
    sel = valid & (prob < thr)
    s = jnp.sum(jnp.where(sel, loss, 0.0))
    cnt = jnp.sum(sel.astype(jnp.float32))
    if reduction == 'sum':
        return s
    return jnp.where(cnt > 0, s / cnt, jnp.float32(0.0))


if __name__ == "__main__":
    key = jax.random.PRNGKey(0)
    N, C, H, W = 2, 4, 16, 16
    ignore_index = 255

    k1, k2, k3 = jax.random.split(key, 3)
    predict = jax.random.normal(k1, (N, C, H, W), dtype=jnp.float32)
    target = jax.random.randint(k2, (N, H, W), 0, C).astype(jnp.int32)
    ign_mask = jax.random.uniform(k3, (N, H, W)) < 0.1
    target = jnp.where(ign_mask, ignore_index, target)

    curr_iter, epoch = 5, 3

    # 1) unweighted / mean — annealed fast path (min_threshold does not bind)
    loss_mod = AbCELossPallas(iters_per_epoch=100, epochs=50, num_classes=C,
                              weight=None, reduction='mean', thresh=0.7,
                              min_kept=10, ramp_type='log_rampup')
    out = jax.block_until_ready(
        loss_mod.forward(predict, target, ignore_index, curr_iter, epoch))
    thresh_ramp = loss_mod.threshold(curr_iter=curr_iter, epoch=epoch)
    ref = reference_abce(predict, target, ignore_index,
                         batch_kept=loss_mod.min_kept * N, thresh=thresh_ramp,
                         weight=None, reduction='mean')
    assert jnp.allclose(out, ref, rtol=1e-4, atol=1e-5), (float(out), float(ref))

    # 2) weighted / sum — exercises the class-weight path
    wvec = np.linspace(0.5, 1.5, C).astype(np.float32)
    loss_mod_w = AbCELossPallas(iters_per_epoch=100, epochs=50, num_classes=C,
                                weight=wvec, reduction='sum', thresh=0.7,
                                min_kept=10, ramp_type='log_rampup')
    out_w = jax.block_until_ready(
        loss_mod_w.forward(predict, target, ignore_index, curr_iter, epoch))
    ref_w = reference_abce(predict, target, ignore_index,
                           batch_kept=loss_mod_w.min_kept * N, thresh=thresh_ramp,
                           weight=wvec, reduction='sum')
    assert jnp.allclose(out_w, ref_w, rtol=1e-4, atol=1e-3), (float(out_w), float(ref_w))

    # 3) large min_kept — the k-th order statistic binds (bootstrapped fallback
    #    path: lax.top_k + kernel 2 selection/reduce)
    loss_mod_b = AbCELossPallas(iters_per_epoch=100, epochs=50, num_classes=C,
                                weight=None, reduction='mean', thresh=0.7,
                                min_kept=300, ramp_type=None)
    out_b = jax.block_until_ready(
        loss_mod_b.forward(predict, target, ignore_index, curr_iter, epoch))
    ref_b = reference_abce(predict, target, ignore_index,
                           batch_kept=loss_mod_b.min_kept * N, thresh=0.7,
                           weight=None, reduction='mean')
    assert jnp.allclose(out_b, ref_b, rtol=1e-4, atol=1e-5), (float(out_b), float(ref_b))

    print("KERNEL_OK")
</pallas_src>

<mosaic_0001>
module attributes {stable_mosaic.version = 11 : i64} {
  func.func @kernel(%arg0: i32, %arg1: i32, %arg2: memref<1xf32, #tpu.memory_space<smem>>, %arg3: memref<1x4x16x16xf32, #tpu.memory_space<vmem>>, %arg4: memref<1x16x16xi32, #tpu.memory_space<vmem>>, %arg5: memref<1x16x16xf32, #tpu.memory_space<vmem>>, %arg6: memref<1x16x16xf32, #tpu.memory_space<vmem>>, %arg7: memref<1x1x1x128xf32, #tpu.memory_space<vmem>>) attributes {dimension_semantics = [#tpu.dimension_semantics<parallel>, #tpu.dimension_semantics<parallel>], iteration_bounds = array<i64: 2, 1>, scalar_prefetch = 0 : i64, scratch_operands = 0 : i64, tpu.core_type = #tpu.core_type<tc>, window_params = [{transform_indices = @transform_0, window_bounds = array<i64: 1>}, {transform_indices = @transform_1, window_bounds = array<i64: 1, 4, 16, 16>}, {transform_indices = @transform_2, window_bounds = array<i64: 1, 16, 16>}, {transform_indices = @transform_3, window_bounds = array<i64: 1, 16, 16>}, {transform_indices = @transform_4, window_bounds = array<i64: 1, 16, 16>}, {transform_indices = @transform_5, window_bounds = array<i64: 1, 1, 1, 128>}]} {
    %c0 = arith.constant 0 : index
    %0 = memref.load %arg2[%c0] : memref<1xf32, #tpu.memory_space<smem>>
    %c0_0 = arith.constant 0 : index
    %c0_1 = arith.constant 0 : index
    %c0_2 = arith.constant 0 : index
    %c0_3 = arith.constant 0 : index
    %1 = vector.load %arg3[%c0_0, %c0_1, %c0_2, %c0_3] : memref<1x4x16x16xf32, #tpu.memory_space<vmem>>, vector<1x4x16x16xf32>
    %c0_4 = arith.constant 0 : index
    %c0_5 = arith.constant 0 : index
    %c0_6 = arith.constant 0 : index
    %2 = vector.load %arg4[%c0_4, %c0_5, %c0_6] : memref<1x16x16xi32, #tpu.memory_space<vmem>>, vector<1x16x16xi32>
    %c255_i32 = arith.constant 255 : i32
    %3 = vector.broadcast %c255_i32 : i32 to vector<1x16x16xi32>
    %4 = arith.cmpi ne, %2, %3 : vector<1x16x16xi32>
    %c0_i32 = arith.constant 0 : i32
    %5 = vector.broadcast %c0_i32 : i32 to vector<1x16x16xi32>
    %6 = arith.select %4, %2, %5 : vector<1x16x16xi1>, vector<1x16x16xi32>
    %cst = arith.constant dense<0xFF800000> : vector<1x16x16xf32>
    %7 = vector.multi_reduction <maximumf>, %1, %cst [1] : vector<1x4x16x16xf32> to vector<1x16x16xf32>
    %8 = vector.shape_cast %7 : vector<1x16x16xf32> to vector<1x1x16x16xf32>
    %9 = vector.broadcast %8 : vector<1x1x16x16xf32> to vector<1x4x16x16xf32>
    %10 = arith.subf %1, %9 : vector<1x4x16x16xf32>
    %11 = math.exp %10 : vector<1x4x16x16xf32>
    %cst_7 = arith.constant dense<0.000000e+00> : vector<1x16x16xf32>
    %12 = vector.multi_reduction <add>, %11, %cst_7 [1] : vector<1x4x16x16xf32> to vector<1x16x16xf32>
    %13 = vector.shape_cast %12 : vector<1x16x16xf32> to vector<1x1x16x16xf32>
    %14 = tpu.iota {dimensions = array<i32: 1>} : vector<1x4x16x16xi32>
    %15 = vector.shape_cast %6 : vector<1x16x16xi32> to vector<1x1x16x16xi32>
    %16 = vector.broadcast %15 : vector<1x1x16x16xi32> to vector<1x4x16x16xi32>
    %17 = arith.cmpi eq, %14, %16 : vector<1x4x16x16xi32>
    %cst_8 = arith.constant 0.000000e+00 : f32
    %18 = vector.broadcast %cst_8 : f32 to vector<1x4x16x16xf32>
    %19 = arith.select %17, %11, %18 : vector<1x4x16x16xi1>, vector<1x4x16x16xf32>
    %cst_9 = arith.constant dense<0.000000e+00> : vector<1x16x16xf32>
    %20 = vector.multi_reduction <add>, %19, %cst_9 [1] : vector<1x4x16x16xf32> to vector<1x16x16xf32>
    %cst_10 = arith.constant 0.000000e+00 : f32
    %21 = vector.broadcast %cst_10 : f32 to vector<1x4x16x16xf32>
    %22 = arith.select %17, %1, %21 : vector<1x4x16x16xi1>, vector<1x4x16x16xf32>
    %cst_11 = arith.constant dense<0.000000e+00> : vector<1x16x16xf32>
    %23 = vector.multi_reduction <add>, %22, %cst_11 [1] : vector<1x4x16x16xf32> to vector<1x16x16xf32>
    %24 = vector.shape_cast %13 : vector<1x1x16x16xf32> to vector<1x16x16xf32>
    %25 = arith.divf %20, %24 : vector<1x16x16xf32>
    %26 = vector.shape_cast %8 : vector<1x1x16x16xf32> to vector<1x16x16xf32>
    %27 = vector.shape_cast %13 : vector<1x1x16x16xf32> to vector<1x16x16xf32>
    %28 = math.log %27 : vector<1x16x16xf32>
    %29 = arith.addf %26, %28 : vector<1x16x16xf32>
    %30 = arith.subf %29, %23 : vector<1x16x16xf32>
    %cst_12 = arith.constant 3.000000e+38 : f32
    %31 = vector.broadcast %cst_12 : f32 to vector<1x16x16xf32>
    %32 = arith.select %4, %25, %31 : vector<1x16x16xi1>, vector<1x16x16xf32>
    %cst_13 = arith.constant 0.000000e+00 : f32
    %33 = vector.broadcast %cst_13 : f32 to vector<1x16x16xf32>
    %34 = arith.select %4, %30, %33 : vector<1x16x16xi1>, vector<1x16x16xf32>
    %c0_14 = arith.constant 0 : index
    %c0_15 = arith.constant 0 : index
    %c0_16 = arith.constant 0 : index
    %35 = vector.load %arg5[%c0_14, %c0_15, %c0_16] : memref<1x16x16xf32, #tpu.memory_space<vmem>>, vector<1x16x16xf32>
    tpu.vector_store %arg5[%c0_14, %c0_15, %c0_16], %32 {strides = array<i32>} : memref<1x16x16xf32, #tpu.memory_space<vmem>>, vector<1x16x16xf32>,
    %c0_17 = arith.constant 0 : index
    %c0_18 = arith.constant 0 : index
    %c0_19 = arith.constant 0 : index
    %36 = vector.load %arg6[%c0_17, %c0_18, %c0_19] : memref<1x16x16xf32, #tpu.memory_space<vmem>>, vector<1x16x16xf32>
    tpu.vector_store %arg6[%c0_17, %c0_18, %c0_19], %34 {strides = array<i32>} : memref<1x16x16xf32, #tpu.memory_space<vmem>>, vector<1x16x16xf32>,
    %37 = vector.broadcast %0 : f32 to vector<1x16x16xf32>
    %38 = arith.cmpf olt, %32, %37 : vector<1x16x16xf32>
    %39 = vector.broadcast %0 : f32 to vector<1x16x16xf32>
    %40 = arith.cmpf ole, %32, %39 : vector<1x16x16xf32>
    %41 = arith.extui %4 : vector<1x16x16xi1> to vector<1x16x16xi32>
    %42 = arith.sitofp %41 : vector<1x16x16xi32> to vector<1x16x16xf32>
    %43 = vector.shape_cast %42 : vector<1x16x16xf32> to vector<1x1x16x16xf32>
    %cst_20 = arith.constant dense<0.000000e+00> : vector<1xf32>
    %44 = vector.multi_reduction <add>, %43, %cst_20 [1, 2, 3] : vector<1x1x16x16xf32> to vector<1xf32>
    %45 = vector.shape_cast %44 : vector<1xf32> to vector<1x1x1x1xf32>
    %46 = vector.extract %45[0, 0, 0, 0] : f32 from vector<1x1x1x1xf32>
    %47 = arith.extui %40 : vector<1x16x16xi1> to vector<1x16x16xi32>
    %48 = arith.sitofp %47 : vector<1x16x16xi32> to vector<1x16x16xf32>
    %49 = vector.shape_cast %48 : vector<1x16x16xf32> to vector<1x1x16x16xf32>
    %cst_21 = arith.constant dense<0.000000e+00> : vector<1xf32>
    %50 = vector.multi_reduction <add>, %49, %cst_21 [1, 2, 3] : vector<1x1x16x16xf32> to vector<1xf32>
    %51 = vector.shape_cast %50 : vector<1xf32> to vector<1x1x1x1xf32>
    %52 = vector.extract %51[0, 0, 0, 0] : f32 from vector<1x1x1x1xf32>
    %53 = arith.extui %38 : vector<1x16x16xi1> to vector<1x16x16xi32>
    %54 = arith.sitofp %53 : vector<1x16x16xi32> to vector<1x16x16xf32>
    %55 = vector.shape_cast %54 : vector<1x16x16xf32> to vector<1x1x16x16xf32>
    %cst_22 = arith.constant dense<0.000000e+00> : vector<1xf32>
    %56 = vector.multi_reduction <add>, %55, %cst_22 [1, 2, 3] : vector<1x1x16x16xf32> to vector<1xf32>
    %57 = vector.shape_cast %56 : vector<1xf32> to vector<1x1x1x1xf32>
    %58 = vector.extract %57[0, 0, 0, 0] : f32 from vector<1x1x1x1xf32>
    %cst_23 = arith.constant 0.000000e+00 : f32
    %59 = vector.broadcast %cst_23 : f32 to vector<1x16x16xf32>
    %60 = arith.select %38, %34, %59 : vector<1x16x16xi1>, vector<1x16x16xf32>
    %61 = vector.shape_cast %60 : vector<1x16x16xf32> to vector<1x1x16x16xf32>
    %cst_24 = arith.constant dense<0.000000e+00> : vector<1xf32>
    %62 = vector.multi_reduction <add>, %61, %cst_24 [1, 2, 3] : vector<1x1x16x16xf32> to vector<1xf32>
    %63 = vector.shape_cast %62 : vector<1xf32> to vector<1x1x1x1xf32>
    %64 = vector.extract %63[0, 0, 0, 0] : f32 from vector<1x1x1x1xf32>
    %65 = tpu.iota {dimensions = array<i32: 3>} : vector<1x1x1x128xi32>
    %c0_i32_25 = arith.constant 0 : i32
    %66 = vector.broadcast %c0_i32_25 : i32 to vector<1x1x1x128xi32>
    %67 = arith.cmpi eq, %65, %66 : vector<1x1x1x128xi32>
    %cst_26 = arith.constant 0.000000e+00 : f32
    %68 = vector.broadcast %46 : f32 to vector<1x1x1x128xf32>
    %69 = vector.broadcast %cst_26 : f32 to vector<1x1x1x128xf32>
    %70 = arith.select %67, %68, %69 : vector<1x1x1x128xi1>, vector<1x1x1x128xf32>
    %c1_i32 = arith.constant 1 : i32
    %71 = vector.broadcast %c1_i32 : i32 to vector<1x1x1x128xi32>
    %72 = arith.cmpi eq, %65, %71 : vector<1x1x1x128xi32>
    %cst_27 = arith.constant 0.000000e+00 : f32
    %73 = vector.broadcast %52 : f32 to vector<1x1x1x128xf32>
    %74 = vector.broadcast %cst_27 : f32 to vector<1x1x1x128xf32>
    %75 = arith.select %72, %73, %74 : vector<1x1x1x128xi1>, vector<1x1x1x128xf32>
    %76 = arith.addf %70, %75 : vector<1x1x1x128xf32>
    %c2_i32 = arith.constant 2 : i32
    %77 = vector.broadcast %c2_i32 : i32 to vector<1x1x1x128xi32>
    %78 = arith.cmpi eq, %65, %77 : vector<1x1x1x128xi32>
    %cst_28 = arith.constant 0.000000e+00 : f32
    %79 = vector.broadcast %58 : f32 to vector<1x1x1x128xf32>
    %80 = vector.broadcast %cst_28 : f32 to vector<1x1x1x128xf32>
    %81 = arith.select %78, %79, %80 : vector<1x1x1x128xi1>, vector<1x1x1x128xf32>
    %82 = arith.addf %76, %81 : vector<1x1x1x128xf32>
    %c3_i32 = arith.constant 3 : i32
    %83 = vector.broadcast %c3_i32 : i32 to vector<1x1x1x128xi32>
    %84 = arith.cmpi eq, %65, %83 : vector<1x1x1x128xi32>
    %cst_29 = arith.constant 0.000000e+00 : f32
    %85 = vector.broadcast %64 : f32 to vector<1x1x1x128xf32>
    %86 = vector.broadcast %cst_29 : f32 to vector<1x1x1x128xf32>
    %87 = arith.select %84, %85, %86 : vector<1x1x1x128xi1>, vector<1x1x1x128xf32>
    %88 = arith.addf %82, %87 : vector<1x1x1x128xf32>
    %c0_30 = arith.constant 0 : index
    %c0_31 = arith.constant 0 : index
    %c0_32 = arith.constant 0 : index
    %c0_33 = arith.constant 0 : index
    %89 = vector.load %arg7[%c0_30, %c0_31, %c0_32, %c0_33] : memref<1x1x1x128xf32, #tpu.memory_space<vmem>>, vector<1x1x1x128xf32>
    tpu.vector_store %arg7[%c0_30, %c0_31, %c0_32, %c0_33], %88 {strides = array<i32>} : memref<1x1x1x128xf32, #tpu.memory_space<vmem>>, vector<1x1x1x128xf32>,
    return
  }
  func.func @transform_0(%arg0: i32, %arg1: i32) -> i32 {
    %c0_i32 = arith.constant 0 : i32
    %c0_i32_0 = arith.constant 0 : i32
    return %c0_i32 : i32
  }
  func.func @transform_1(%arg0: i32, %arg1: i32) -> (i32, i32, i32, i32) {
    %c0_i32 = arith.constant 0 : i32
    %c0_i32_0 = arith.constant 0 : i32
    %c0_i32_1 = arith.constant 0 : i32
    return %arg0, %c0_i32, %arg1, %c0_i32_0 : i32, i32, i32, i32
  }
  func.func @transform_2(%arg0: i32, %arg1: i32) -> (i32, i32, i32) {
    %c0_i32 = arith.constant 0 : i32
    %c0_i32_0 = arith.constant 0 : i32
    return %arg0, %arg1, %c0_i32 : i32, i32, i32
  }
  func.func @transform_3(%arg0: i32, %arg1: i32) -> (i32, i32, i32) {
    %c0_i32 = arith.constant 0 : i32
    %c0_i32_0 = arith.constant 0 : i32
    return %arg0, %arg1, %c0_i32 : i32, i32, i32
  }
  func.func @transform_4(%arg0: i32, %arg1: i32) -> (i32, i32, i32) {
    %c0_i32 = arith.constant 0 : i32
    %c0_i32_0 = arith.constant 0 : i32
    return %arg0, %arg1, %c0_i32 : i32, i32, i32
  }
  func.func @transform_5(%arg0: i32, %arg1: i32) -> (i32, i32, i32, i32) {
    %c0_i32 = arith.constant 0 : i32
    %c0_i32_0 = arith.constant 0 : i32
    %c0_i32_1 = arith.constant 0 : i32
    return %arg0, %arg1, %c0_i32, %c0_i32_0 : i32, i32, i32, i32
  }
}

</mosaic_0001>

<bundles_post_ra>
// kernel: tpu_custom_call.1
= control target key start
LH: loop header
LB: loop body
LE: loop exit
PB: predicated region body
PF: predicated region fallthrough
CT: control target
= control target key end

     0   :  { %s1607_s0 = inlined_call_operand.<no memory space> [shape: f32[1], index: 0, kind: input, shape index: {}]   ;;  %s1608_s1 = inlined_call_operand.hbm [shape: f32[2,4,16,16], index: 1, kind: input, shape index: {}]   ;;  %s1609_s2 = inlined_call_operand.hbm [shape: s32[2,16,16], index: 2, kind: input, shape index: {}]   ;;  %s1610_s3 = inlined_call_operand.hbm [shape: f32[2,16,16], index: 3, kind: output, shape index: {0}]   ;;  %s1611_s4 = inlined_call_operand.hbm [shape: f32[2,16,16], index: 4, kind: output, shape index: {1}]   ;;  %s1612_s5 = inlined_call_operand.hbm [shape: f32[2,1,1,128], index: 5, kind: output, shape index: {2}]  }
   0x1   :  { %1616 = sst [smem:[#allocation18_spill]] %s1608_s1 }
   0x2   :  { %11 = sst [smem:[#allocation2]] %s1607_s0 }
   0x3   :  { %12 = vsyncpa [#allocation4], 0 }
   0x4   :  { %14 = vsyncpa [#allocation4 + $0x1], 0 }
   0x5   :  { %15 = vsyncpa [#allocation7], 0 }
   0x6   :  { %17 = vsyncpa [#allocation7 + $0x1], 0 }
   0x7   :  { %18 = vsyncpa [#allocation5], 0 }
   0x8   :  { %20 = vsyncpa [#allocation5 + $0x1], 0 }
   0x9   :  { %21 = vsyncpa [#allocation10], 0 }
   0xa   :  { %23 = vsyncpa [#allocation10 + $0x1], 0  ;;  %s1214_s20 = smov 0   ;;  %s1216_s21 = smov 0  }
   0xb   :  { %s1218_s22 = smov 0   ;;  %s1220_s23 = smov 0  }
   0xc   :  { %s1222_s24 = smov 0   ;;  %s1224_s25 = smov 0  }
   0xd LB: > { %1617 = sst [smem:[#allocation16_spill]] %s1170_s24  ;;  %s1245_s0 = sadd.s32 4294967295, %s1174_s25   ;;  %s1174_s25 = sphi %s1224_s25, %s29_s25   ;;  %s1170_s24 = sphi %s1222_s24, %s1631_s24   ;;  %s1166_s23 = sphi %s1220_s23, %s1630_s23   ;;  %s1162_s22 = sphi %s1218_s22, %s1634_s22   ;;  %s1158_s21 = sphi %s1216_s21, %s1633_s21   ;;  %s1154_s20 = sphi %s1214_s20, %s1632_s20  }
   0xe   : > { %s1613_s26 = sadd.s32 4294967294, %s1174_s25   ;;  %s41_s27 = sadd.s32 1, %s1170_s24 }
   0xf   : > { %s71_s28 = sadd.s32 1, %s1162_s22  ;;  %p43_p0 = scmp.ge.s32.totalorder %s41_s27, 2 }
  0x10   : > { %p78_p1 = scmp.ne.s32.totalorder %s1162_s22, %s1158_s21  ;;  %p79_p2 = scmp.eq.s32.totalorder %s1174_s25, 0 }
  0x11   : > { %p84_p3 = scmp.ne.s32.totalorder %s1158_s21, %s1154_s20  ;;  %s1636_s27 = smov (%p43_p0, %s41_s27), 0 }
  0x12   : > { %1618 = sst [smem:[#allocation17_spill]] %s1636_s27  ;;  %p1257_p4 = por %p79_p2, %p78_p1 }
  0x13   : > { %p85_p5 = scmp.eq.s32.totalorder %s1245_s0, 0  ;;  %s66_s30 = ssub.s32 %s1170_s24, %s1636_s27 }
  0x14   : > { %p138_p6 = scmp.eq.s32.totalorder %s1245_s0, 1  ;;  %p69_p7 = scmp.eq.s32.totalorder %s66_s30, 0 }
  0x15   : > { %p1265_p8 = por %p85_p5, %p84_p3  ;;  %p144_p10 = scmp.eq.s32.totalorder %s1613_s26, 1 }
  0x16   : > { %p1269_p9 = por %p138_p6, %p78_p1  ;;  %p824_p12 = scmp.ge.s32.totalorder %s1174_s25, 2 }
  0x17   : > { %s1276_s8 = scalar_select %p69_p7, %s1162_s22, %s71_s28  }
  0x18   : > { %p1278_p11 = por %p144_p10, %p84_p3  ;;  %p889_p13 = scmp.lt.s32.totalorder %s1174_s25, 2 }
  0x19   : > { %s1285_s10 = sand.u32 1, %s1162_s22   ;;  %s850_s12 = sshll.u32 %s1170_s24, 6 }
  0x1a   : > { %s825_s11 = sshll.u32 %s1285_s10, 6  ;;  %s1623_s1 = sld [smem:[#allocation18_spill]] }
  0x1b   : > { %s227_s16 = scalar_lea.vmem [#allocation3], %s825_s11  ;;  %p1294_p0 = pnand %p889_p13, %p1257_p4 }
  0x1c   : > { %s237_s17 = sshll.u32 %s227_s16, 4  ;;  %p831_p1 = scmp.ge.s32.totalorder %s1174_s25, 1  ;;  %s238_s17 = int_to_ptr.vmem [resolvable:$true] %s237_s17 }
  0x1d   : > { %s224_s28 = scalar_lea.sflag [#allocation4], %s1285_s10  ;;  %s1176_s30 = smov 128  }
  0x1e   : > { %s1177_s26 = smov 8   ;;  %p269_p2 = scmp.lt.s32.totalorder %s1174_s25, 3 }
  0x1f   : > { %s828_s11 = sshll.u32 %s1285_s10, 4  ;;  %s248_s27 = scalar_lea.sflag [#allocation7], %s1285_s10 }
  0x20   : > { %s234_s15 = scalar_lea.hbm %s1623_s1, %s850_s12  ;;  %s851_s12 = sshll.u32 %s1170_s24, 4 }
  0x21   : > { %s235_s18 = sshll.u32 %s234_s15, 4  ;;  %p270_p3 = pnand %p831_p1, %p269_p2  ;;  %s236_s18 = int_to_ptr.hbm [resolvable:$true] %s235_s18 }
  0x22   : > { %875 = dma.hbm_to_vmem [thread:$0]  (!%p1294_p0), %s236_s18, 1024, %s238_s17, %s224_s28, %s1176_s30, %s1176_s30, %s1177_s26  }
  0x23   : > { %s258_s29 = scalar_lea.hbm %s1609_s2, %s851_s12  ;;  %s251_s15 = scalar_lea.vmem [#allocation6], %s828_s11 }
  0x24   : > { %s261_s16 = sshll.u32 %s251_s15, 4  ;;  %s259_s1 = sshll.u32 %s258_s29, 4  ;;  %s262_s16 = int_to_ptr.vmem [resolvable:$true] %s261_s16  ;;  %s260_s1 = int_to_ptr.hbm [resolvable:$true] %s259_s1 }
  0x25   : > { %878 = dma.hbm_to_vmem [thread:$0]  (!%p1294_p0), %s260_s1, 256, %s262_s16, %s248_s27, %s1176_s30, %s1176_s30, %s1177_s26  }
  0x26   : > { %273 = sbr.rel (%p270_p3) target bundleno = 295 (0x127), region = 32  ;;  %s1312_s17 = sand.u32 (!%p270_p3), 1, %s1158_s21  }
  0x27   : > { %s832_s18 = sshll.u32 (!%p270_p3), %s1312_s17, 6  ;;  %s276_s28 = scalar_lea.sflag (!%p270_p3), [#allocation4], %s1312_s17 }
  0x28   : > { %s279_s24 = scalar_lea.vmem (!%p270_p3), [#allocation3], %s832_s18 }
  0x2b   : > { %1137 = dma.done.wait (%p1265_p8), %s276_s28, 1024  }
  0x2c   : > { %1139 = vsyncadd (%p1265_p8), %s276_s28, 4294966272  ;;  %s1321_s10 = sshll.u32 %s1312_s17, 4  ;;  %s286_s1 = scalar_lea.sflag [#allocation7], %s1312_s17 }
  0x2d   : > { %s289_s26 = scalar_lea.vmem [#allocation6], %s1321_s10 }
  0x2e   : > { %1141 = dma.done.wait (%p1265_p8), %s286_s1, 256  }
  0x2f   : > { %1143 = vsyncadd (%p1265_p8), %s286_s1, 4294967040  ;;  %v1329_v0 = vld [vmem:[%s289_s26] sm:$0xff]  ;;  %v1331_v1 = vld [vmem:[%s289_s26 + $0x8] sm:$0xff]  ;;  %vm350_vm0 = vcmask 130048   ;;  %v1178_v4 = vmov 0.0   ;;  %s1503_s27 = scalar_lea.vmem [#allocation9], %s1321_s10 }
  0x30   : > { %v1333_v2 = vld [vmem:[%s279_s24] sm:$0xff]  ;;  %vm346_vm1 = vcmp.ne.s32.totalorder %v1329_v0, 255  ;;  %vm347_vm2 = vcmp.ne.s32.totalorder %v1331_v1, 255  ;;  %v1337_v3 = vld [vmem:[%s279_s24 + $0x10] sm:$0xff]  ;;  %v1345_v7 = vld [vmem:[%s279_s24 + $0x8] sm:$0xff]  ;;  %s1510_s6 = scalar_lea.vmem [#allocation8], %s1321_s10 }
  0x31   : > { %v836_v5 = vsel %vm346_vm1, 1.0, %v1178_v4  ;;  %v837_v6 = vsel %vm347_vm2, 1.0, %v1178_v4  ;;  %v1347_v8 = vld [vmem:[%s279_s24 + $0x20] sm:$0xff]  ;;  %v1349_v9 = vld [vmem:[%s279_s24 + $0x30] sm:$0xff]  ;;  %v1351_v10 = vld [vmem:[%s279_s24 + $0x18] sm:$0xff]  ;;  %v351_v12 = vsel %vm350_vm0, %v1333_v2, -inf }
  0x32   : > { %v1353_v11 = vld [vmem:[%s279_s24 + $0x28] sm:$0xff]  ;;  %v510_v13 = vsel %vm350_vm0, %v836_v5, 0.0  ;;  %v511_v14 = vsel %vm350_vm0, %v837_v6, 0.0  ;;  %v1359_v15 = vld [vmem:[%s279_s24 + $0x38] sm:$0xff]  ;;  %v352_v16 = vsel %vm350_vm0, %v1337_v3, -inf  ;;  %v353_v18 = vsel %vm350_vm0, %v1347_v8, -inf }
  0x33   : > { %v512_v17 = vadd.f32 %v511_v14, %v510_v13  ;;  %v355_v19 = vsel %vm350_vm0, %v1349_v9, -inf  ;;  %v358_v20 = vsel %vm350_vm0, %v1345_v7, -inf  ;;  %v354_v21 = vmax.f32 %v351_v12, %v353_v18  ;;  %s1473_s24 = sld [smem:[#allocation2]]  ;;  %s629_s19 = sshll.u32 %s1503_s27, 4  ;;  %s630_s19 = int_to_ptr.vmem [resolvable:$true] %s629_s19 }
  0x34   : > { %v356_v22 = vmax.f32 %v352_v16, %v355_v19  ;;  %v359_v23 = vsel %vm350_vm0, %v1351_v10, -inf  ;;  %v360_v24 = vsel %vm350_vm0, %v1353_v11, -inf  ;;  %v362_v26 = vsel %vm350_vm0, %v1359_v15, -inf  ;;  %s852_s30 = sshll.u32 %s1166_s23, 4  ;;  %s591_s14 = sand.u32 1, %s1245_s0  }
  0x35   : > { %513 = vadd.xlane.f32.xlu0 %v512_v17  ;;  %v361_v25 = vmax.f32 %v358_v20, %v360_v24  ;;  %v363_v28 = vmax.f32 %v359_v23, %v362_v26  ;;  %v1398_v46 = vsel %vm347_vm2, %v1331_v1, 0  ;;  %v1403_v47 = vsel %vm346_vm1, %v1329_v0, 0  ;;  %s628_s13 = scalar_lea.hbm %s1611_s4, %s852_s30  ;;  %s1538_s15 = scalar_lea.sflag [#allocation10], %s591_s14 }
  0x36   : > { %v1375_v27 = vmax.f32 %v354_v21, %v356_v22  ;;  %vm404_vm3 = vcmp.eq.s32.totalorder %v1398_v46, 0  ;;  %vm403_vm4 = vcmp.eq.s32.totalorder %v1403_v47, 0  ;;  %vm405_vm5 = vcmp.eq.s32.totalorder %v1403_v47, 1  ;;  %s631_s29 = sshll.u32 %s628_s13, 4  ;;  %s1048_s1 = scalar_lea.hbm %s1611_s4, 32  ;;  %s632_s29 = int_to_ptr.hbm [resolvable:$true] %s631_s29 }
  0x37   : > { %v1377_v29 = vmax.f32 %v361_v25, %v363_v28  ;;  %vm406_vm6 = vcmp.eq.s32.totalorder %v1398_v46, 1  ;;  %vm408_vm7 = vcmp.eq.s32.totalorder %v1398_v46, 2  ;;  %vm407_vm8 = vcmp.eq.s32.totalorder %v1403_v47, 2  ;;  %s1042_s16 = sshra.s32 %s632_s29, 4  ;;  %s1043_s16 = int_to_ptr.hbm [resolvable:$true] %s1042_s16 }
  0x38   : > { %v365_v30 = vsub.f32 %v1333_v2, %v1375_v27  ;;  %v367_v31 = vsub.f32 %v1337_v3, %v1375_v27  ;;  %v369_v32 = vsub.f32 %v1347_v8, %v1375_v27  ;;  %v371_v33 = vsub.f32 %v1349_v9, %v1375_v27  ;;  %s1044_s18 = scalar_lea.hbm %s1043_s16, 16  ;;  %p1049_p7 = scmp.lt.s32.totalorder %s1043_s16, %s1611_s4 }
  0x39   : > { %v366_v34 = vsub.f32 %v1345_v7, %v1377_v29  ;;  %v368_v35 = vsub.f32 %v1351_v10, %v1377_v29  ;;  %v370_v36 = vsub.f32 %v1353_v11, %v1377_v29  ;;  %v372_v39 = vsub.f32 %v1359_v15, %v1377_v29  ;;  %p1045_p4 = scmp.ne.s32.totalorder %s1043_s16, %s1044_s18  ;;  %p1050_p8 = scmp.lt.s32.totalorder %s1048_s1, %s1044_s18 }
  0x3a   : > { %v373_v37 = vmul.f32 1.442695, %v365_v30  ;;  %v377_v38 = vmul.f32 1.442695, %v367_v31  ;;  %v381_v42 = vmul.f32 1.442695, %v369_v32 }
  0x3b   : > { %v375_v40 = vmul.f32 1.442695, %v366_v34  ;;  %v379_v41 = vmul.f32 1.442695, %v368_v35  ;;  %v383_v43 = vmul.f32 1.442695, %v370_v36  ;;  %p1046_p5 = pnand %p1045_p4, %p1269_p9  ;;  %p1051_p10 = por %p1050_p8, %p1049_p7 }
  0x3c   : > { %944 = vpow2.f32 %v373_v37  ;;  %v385_v44 = vmul.f32 1.442695, %v371_v33  ;;  %v387_v45 = vmul.f32 1.442695, %v372_v39  ;;  %vm409_vm9 = vcmp.eq.s32.totalorder %v1403_v47, 3 }
  0x3d   : > { %946 = vpow2.f32 %v377_v38  ;;  %v433_v58 = vsel %vm403_vm4, %v1333_v2, 0.0  ;;  %v434_v13 = vsel %vm404_vm3, %v1345_v7, 0.0  ;;  %v435_v2 = vsel %vm405_vm5, %v1337_v3, 0.0  ;;  %p1047_p6 = pneg %p1046_p5 }
  0x3e   : > { %948 = vpow2.f32 %v375_v40  ;;  %v436_v23 = vsel %vm406_vm6, %v1351_v10, 0.0  ;;  %v441_v25 = vsel %vm350_vm0, %v433_v58, 0.0  ;;  %v442_v30 = vsel %vm350_vm0, %v435_v2, 0.0 }
  0x3f   : > { %950 = vpow2.f32 %v379_v41  ;;  %v437_v10 = vsel %vm407_vm8, %v1347_v8, 0.0  ;;  %vm410_vm10 = vcmp.eq.s32.totalorder %v1398_v46, 3  ;;  %v448_v34 = vsel %vm350_vm0, %v434_v13, 0.0  ;;  %p1052_p13 = pnand %p1051_p10, %p1047_p6 }
  0x40   : > { %952 = vpow2.f32 %v381_v42  ;;  %v449_v35 = vsel %vm350_vm0, %v436_v23, 0.0  ;;  %v438_v38 = vsel %vm408_vm7, %v1353_v11, 0.0  ;;  %v443_v39 = vadd.f32 %v442_v30, %v441_v25 }
  0x41   : > { %954 = vpow2.f32 %v383_v43  ;;  %v439_v8 = vsel %vm409_vm9, %v1349_v9, 0.0  ;;  %v440_v41 = vsel %vm410_vm10, %v1359_v15, 0.0  ;;  %v444_v42 = vsel %vm350_vm0, %v437_v10, 0.0 }
  0x42   : > { %v945_v48 = vpop.eup %944  ;;  %956 = vpow2.f32 %v385_v44  ;;  %v451_v11 = vsel %vm350_vm0, %v438_v38, 0.0 }
  0x43   : > { %v947_v49 = vpop.eup %946  ;;  %v389_v50 = vsel %vm350_vm0, %v945_v48, 0.0  ;;  %958 = vpow2.f32 %v387_v45  ;;  %v411_v62 = vsel %vm403_vm4, %v945_v48, 0.0  ;;  %v450_v45 = vadd.f32 %v449_v35, %v448_v34 }
  0x44   : > { %v949_v51 = vpop.eup %948  ;;  %v390_v52 = vsel %vm350_vm0, %v947_v49, 0.0  ;;  %v413_v63 = vsel %vm405_vm5, %v947_v49, 0.0  ;;  %v419_v20 = vsel %vm350_vm0, %v411_v62, 0.0 }
  0x45   : > { %v951_v53 = vpop.eup %950  ;;  %v391_v54 = vadd.f32 %v390_v52, %v389_v50  ;;  %v396_v55 = vsel %vm350_vm0, %v949_v51, 0.0  ;;  %v412_v17 = vsel %vm404_vm3, %v949_v51, 0.0  ;;  %v420_v21 = vsel %vm350_vm0, %v413_v63, 0.0 }
  0x46   : > { %v953_v56 = vpop.eup %952  ;;  %v397_v57 = vsel %vm350_vm0, %v951_v53, 0.0  ;;  %v414_v18 = vsel %vm406_vm6, %v951_v53, 0.0  ;;  %v426_v26 = vsel %vm350_vm0, %v412_v17, 0.0  ;;  %v421_v32 = vadd.f32 %v420_v21, %v419_v20 }
  0x47   : > { %v955_v59 = vpop.eup %954  ;;  %v392_v60 = vsel %vm350_vm0, %v953_v56, 0.0  ;;  %v398_v61 = vadd.f32 %v397_v57, %v396_v55  ;;  %v415_v3 = vsel %vm407_vm8, %v953_v56, 0.0  ;;  %v427_v28 = vsel %vm350_vm0, %v414_v18, 0.0 }
  0x48   : > { %v957_v5 = vpop.eup %956  ;;  %v393_v6 = vadd.f32 %v392_v60, %v391_v54  ;;  %v399_v12 = vsel %vm350_vm0, %v955_v59, 0.0  ;;  %v416_v31 = vsel %vm408_vm7, %v955_v59, 0.0  ;;  %v422_v33 = vsel %vm350_vm0, %v415_v3, 0.0 }
  0x49   : > { %v959_v14 = vpop.eup %958  ;;  %v400_v16 = vadd.f32 %v399_v12, %v398_v61  ;;  %v394_v19 = vsel %vm350_vm0, %v957_v5, 0.0  ;;  %v417_v36 = vsel %vm409_vm9, %v957_v5, 0.0  ;;  %v428_v37 = vadd.f32 %v427_v28, %v426_v26 }
  0x4a   : > { %v395_v22 = vadd.f32 %v394_v19, %v393_v6  ;;  %v401_v7 = vsel %vm350_vm0, %v959_v14, 0.0  ;;  %v429_v40 = vsel %vm350_vm0, %v416_v31, 0.0  ;;  %v418_v43 = vsel %vm410_vm10, %v959_v14, 0.0 }
  0x4b   : > { %v1440_v24 = vadd.f32 %v401_v7, %v400_v16  ;;  %v423_v44 = vadd.f32 %v422_v33, %v421_v32  ;;  %v424_v49 = vsel %vm350_vm0, %v417_v36, 0.0  ;;  %v430_v50 = vadd.f32 %v429_v40, %v428_v37 }
  0x4c   : > { %960 = vrcp.f32 %v395_v22  ;;  %vm460_vm11 = vweird.f32 %v395_v22  ;;  %v464_v9 = vand.u32 2147483647, %v395_v22  ;;  %v466_v51 = vand.u32 2147483648, %v395_v22 }
  0x4d   : > { %962 = vrcp.f32 %v1440_v24  ;;  %vm475_vm12 = vweird.f32 %v1440_v24  ;;  %v481_v52 = vand.u32 2147483648, %v1440_v24  ;;  %v445_v53 = vadd.f32 %v444_v42, %v443_v39 }
  0x4e   : > { %964 = vlog2.f32 %v395_v22  ;;  %v446_v55 = vsel %vm350_vm0, %v439_v8, 0.0  ;;  %v452_v56 = vadd.f32 %v451_v11, %v450_v45  ;;  %v479_v58 = vand.u32 2147483647, %v1440_v24 }
  0x4f   : > { %966 = vlog2.f32 %v1440_v24  ;;  %v453_v59 = vsel %vm350_vm0, %v440_v41, 0.0  ;;  %v425_v61 = vadd.f32 %v424_v49, %v423_v44  ;;  %v431_v62 = vsel %vm350_vm0, %v418_v43, 0.0 }
  0x50   : > { %vm1479_vm15 = vcmp.eq.f32.partialorder %v464_v9, 8.507059e+37  ;;  %v467_v13 = vor.u32 1.1754944e-38, %v466_v51  ;;  %v447_v14 = vadd.f32 %v446_v55, %v445_v53  ;;  %v482_v18 = vor.u32 1.1754944e-38, %v481_v52 }
  0x51   : > { %v454_v19 = vadd.f32 %v453_v59, %v452_v56  ;;  %v432_v21 = vadd.f32 %v431_v62, %v430_v50  ;;  %vm480_vm5 = vcmp.eq.f32.partialorder %v479_v58, 8.507059e+37  ;;  %v501_v31 = vstv %s1473_s24 }
  0x52   : > { %v961_v48 = vpop.eup %960 }
  0x53   : > { %v963_v46 = vpop.eup %962  ;;  %v456_v47 = vmul.f32 %v961_v48, %v395_v22  ;;  %vm461_vm13 = vweird.f32 %v961_v48 }
  0x54   : > { %v471_v15 = vmul.f32 %v963_v46, %v1440_v24  ;;  %vm476_vm14 = vweird.f32 %v963_v46  ;;  %v965_v60 = vpop.eup %964  ;;  %vm1484_vm3 = vmor %vm460_vm11, %vm461_vm13 }
  0x55   : > { %v457_v54 = vsub.f32 1.0, %v456_v47  ;;  %v967_v6 = vpop.eup %966  ;;  %v486_v16 = vmul.f32 0.6931472, %v965_v60  ;;  %vm477_vm4 = vmor %vm475_vm12, %vm476_vm14 }
  0x56   : > { %v472_v57 = vsub.f32 1.0, %v471_v15  ;;  %v488_v20 = vmul.f32 0.6931472, %v967_v6 }
  0x57   : > { %v458_v63 = vmul.f32 %v961_v48, %v457_v54  ;;  %v489_v7 = vadd.f32 %v486_v16, %v1375_v27 }
  0x58   : > { %v473_v2 = vmul.f32 %v963_v46, %v472_v57  ;;  %v490_v23 = vadd.f32 %v488_v20, %v1377_v29 }
  0x59   : > { %v459_v17 = vadd.f32 %v961_v48, %v458_v63  ;;  %v491_v26 = vsub.f32 %v489_v7, %v447_v14 }
  0x5a   : > { %v474_v22 = vadd.f32 %v963_v46, %v473_v2  ;;  %v492_v32 = vsub.f32 %v490_v23, %v454_v19 }
  0x5b   : > { %v463_v3 = vsel %vm1484_vm3, %v961_v48, %v459_v17  ;;  %v495_v33 = vsel %vm346_vm1, %v491_v26, 0.0 }
  0x5c   : > { %v468_v24 = vsel %vm1479_vm15, %v467_v13, %v463_v3  ;;  %v478_v25 = vsel %vm477_vm4, %v963_v46, %v474_v22  ;;  %499 = vst.msk [vmem:[%s1503_s27] sm:$0xff] %vm350_vm0, %v495_v33  ;;  %v496_v0 = vsel %vm347_vm2, %v492_v32, 0.0 }
  0x5d   : > { %v469_v28 = vmul.f32 %v468_v24, %v425_v61  ;;  %v483_v30 = vsel %vm480_vm5, %v482_v18, %v478_v25  ;;  %500 = vst.msk [vmem:[%s1503_s27 + $0x8] sm:$0xff] %vm350_vm0, %v496_v0 }
  0x5e   : > { %v484_v10 = vmul.f32 %v483_v30, %v432_v21 }
  0x5f   : > { %v493_v27 = vsel %vm346_vm1, %v469_v28, 3e+38 }
  0x60   : > { %v494_v29 = vsel %vm347_vm2, %v484_v10, 3e+38  ;;  %497 = vst.msk [vmem:[%s1510_s6] sm:$0xff] %vm350_vm0, %v493_v27  ;;  %vm504_vm6 = vcmp.le.f32.partialorder %v493_v27, %v501_v31  ;;  %vm502_vm7 = vcmp.lt.f32.partialorder %v493_v27, %v501_v31 }
  0x61   : > { %498 = vst.msk [vmem:[%s1510_s6 + $0x8] sm:$0xff] %vm350_vm0, %v494_v29  ;;  %vm505_vm1 = vcmp.le.f32.partialorder %v494_v29, %v501_v31  ;;  %v838_v34 = vsel %vm504_vm6, 1.0, %v1178_v4  ;;  %vm503_vm8 = vcmp.lt.f32.partialorder %v494_v29, %v501_v31  ;;  %v840_v35 = vsel %vm502_vm7, 1.0, %v1178_v4 }
  0x62   : > { %v839_v36 = vsel %vm505_vm1, 1.0, %v1178_v4  ;;  %v526_v37 = vsel %vm350_vm0, %v838_v34, 0.0  ;;  %v841_v38 = vsel %vm503_vm8, 1.0, %v1178_v4  ;;  %v542_v1 = vsel %vm350_vm0, %v840_v35, 0.0 }
  0x63   : > { %v527_v39 = vsel %vm350_vm0, %v839_v36, 0.0  ;;  %v543_v40 = vsel %vm350_vm0, %v841_v38, 0.0  ;;  %v554_v42 = vsel %vm502_vm7, %v495_v33, 0.0  ;;  %v555_v43 = vsel %vm503_vm8, %v496_v0, 0.0 }
  0x64   : > { %v528_v8 = vadd.f32 %v527_v39, %v526_v37  ;;  %v544_v41 = vadd.f32 %v543_v40, %v542_v1  ;;  %v556_v44 = vsel %vm350_vm0, %v554_v42, 0.0  ;;  %v557_v4 = vsel %vm350_vm0, %v555_v43, 0.0 }
  0x65   : > { %v558_v45 = vadd.f32 %v557_v4, %v556_v44 }
  0x66   : > { %529 = vadd.xlane.f32.xlu0 %v528_v8  ;;  %545 = vadd.xlane.f32.xlu1 %v544_v41 }
  0x6e   : > { %559 = vadd.xlane.f32.xlu1 %v558_v45 }
  0x6f   : > { %1055 = shalt.err (!%p1052_p13)
}
  0x70   : > { %s1179_s0 = smov 128   ;;  %s1180_s27 = smov 8  }
  0x71   : > { %867 = dma.vmem_to_hbm [thread:$0]  (%p1269_p9), %s630_s19, 256, %s632_s29, %s1538_s15, %s1179_s0, %s1179_s0, %s1180_s27  }
  0x72   : > { %s609_s13 = scalar_lea.hbm %s1610_s3, %s852_s30  ;;  %s610_s14 = sshll.u32 %s1510_s6, 4  ;;  %s611_s14 = int_to_ptr.vmem [resolvable:$true] %s610_s14 }
  0x73   : > { %s612_s16 = sshll.u32 %s609_s13, 4  ;;  %s587_s18 = scalar_lea.sflag [#allocation5], %s1312_s17  ;;  %s613_s16 = int_to_ptr.hbm [resolvable:$true] %s612_s16 }
  0x74   : > { %s1070_s28 = sshra.s32 %s613_s16, 4  ;;  %s1076_s29 = scalar_lea.hbm %s1610_s3, 32  ;;  %s1071_s28 = int_to_ptr.hbm [resolvable:$true] %s1070_s28 }
  0x75   : > { %s1072_s10 = scalar_lea.hbm %s1071_s28, 16  ;;  %p1077_p3 = scmp.lt.s32.totalorder %s1071_s28, %s1610_s3 }
  0x76   : > { %p1073_p0 = scmp.ne.s32.totalorder %s1071_s28, %s1072_s10  ;;  %p1078_p4 = scmp.lt.s32.totalorder %s1076_s29, %s1072_s10 }
  0x78   : > { %p1074_p1 = pnand %p1073_p0, %p1269_p9  ;;  %p1079_p5 = por %p1078_p4, %p1077_p3 }
  0x7a   : > { %p1075_p2 = pneg %p1074_p1 }
  0x7c   : > { %p1080_p6 = pnand %p1079_p5, %p1075_p2 }
  0xa8   : > { %v514_v48 = vpop.xlane.xlu0 %513 }
  0xa9   : > { %v515_v49 = vrot.slane %v514_v48, 4 }
  0xaa   : > { %1083 = shalt.err (!%p1080_p6)
}
  0xab   : > { %866 = dma.vmem_to_hbm [thread:$0]  (%p1269_p9), %s611_s14, 256, %s613_s16, %s587_s18, %s1179_s0, %s1179_s0, %s1180_s27   ;;  %v516_v11 = vadd.f32 %v515_v49, %v514_v48  ;;  %v568_v17 = vlaneseq }
  0xac   : > { %s644_s12 = scalar_lea.hbm %s1612_s5, %s1166_s23  ;;  %s330_s13 = scalar_lea.vmem [#allocation11], %s1312_s17 }
  0xad   : > { %v517_v46 = vrot.slane %v516_v11, 2  ;;  %v569_v18 = vand.u32 127, %v568_v17  ;;  %s646_s14 = sshll.u32 %s330_s13, 4  ;;  %s648_s18 = sshll.u32 %s644_s12, 4  ;;  %s647_s14 = int_to_ptr.vmem [resolvable:$true] %s646_s14  ;;  %s649_s18 = int_to_ptr.hbm [resolvable:$true] %s648_s18 }
  0xae   : > { %s1098_s28 = sshra.s32 %s649_s18, 4  ;;  %s1104_s1 = scalar_lea.hbm %s1612_s5, 2  ;;  %s1099_s28 = int_to_ptr.hbm [resolvable:$true] %s1098_s28 }
  0xaf   : > { %v518_v50 = vadd.f32 %v517_v46, %v516_v11  ;;  %vm573_vm0 = vcmp.eq.s32.totalorder %v569_v18, 1  ;;  %vm570_vm2 = vcmp.eq.s32.totalorder %v569_v18, 0  ;;  %vm577_vm9 = vcmp.eq.s32.totalorder %v569_v18, 2  ;;  %s1100_s10 = scalar_lea.hbm %s1099_s28, 1  ;;  %p1105_p13 = scmp.lt.s32.totalorder %s1099_s28, %s1612_s5 }
  0xb0   : > { %vm581_vm10 = vcmp.eq.s32.totalorder %v569_v18, 3  ;;  %p1101_p7 = scmp.ne.s32.totalorder %s1099_s28, %s1100_s10  ;;  %p1106_p0 = scmp.lt.s32.totalorder %s1104_s1, %s1100_s10 }
  0xb1   : > { %v519_v47 = vrot.slane %v518_v50, 1 }
  0xb2   : > { %p1102_p8 = pnand %p1101_p7, %p1269_p9  ;;  %p1107_p1 = por %p1106_p0, %p1105_p13 }
  0xb3   : > { %v520_v9 = vadd.f32 %v519_v47, %v518_v50 }
  0xb4   : > { %p1103_p10 = pneg %p1102_p8 }
  0xb5   : > { %854 = vpush %v520_v9 }
  0xb6   : > { %p1108_p2 = pnand %p1107_p1, %p1103_p10 }
  0xd9   : > { %v530_v51 = vpop.xlane.xlu0 %529  ;;  %v546_v15 = vpop.xlane.xlu1 %545 }
  0xda   : > { %v531_v52 = vrot.slane %v530_v51, 4  ;;  %v547_v53 = vrot.slane %v546_v15, 4 }
  0xdc   : > { %v532_v54 = vadd.f32 %v531_v52, %v530_v51  ;;  %v548_v55 = vadd.f32 %v547_v53, %v546_v15 }
  0xde   : > { %v533_v56 = vrot.slane %v532_v54, 2  ;;  %v549_v57 = vrot.slane %v548_v55, 2 }
  0xe0   : > { %v534_v58 = vadd.f32 %v533_v56, %v532_v54  ;;  %v550_v59 = vadd.f32 %v549_v57, %v548_v55 }
  0xe1   : > { %v560_v60 = vpop.xlane.xlu1 %559 }
  0xe2   : > { %v561_v61 = vrot.slane %v560_v60, 4  ;;  %v535_v62 = vrot.slane %v534_v58, 1  ;;  %v551_v63 = vrot.slane %v550_v59, 1 }
  0xe4   : > { %v562_v5 = vadd.f32 %v561_v61, %v560_v60  ;;  %v536_v6 = vadd.f32 %v535_v62, %v534_v58  ;;  %v552_v12 = vadd.f32 %v551_v63, %v550_v59 }
  0xe6   : > { %v563_v13 = vrot.slane %v562_v5, 2  ;;  %856 = vpush %v536_v6  ;;  %s855_s6 = spop %854 }
  0xe7   : > { %858 = vpush %v552_v12  ;;  %v571_v19 = vstv %s855_s6 }
  0xe8   : > { %v564_v2 = vadd.f32 %v563_v13, %v562_v5  ;;  %v572_v22 = vsel %vm570_vm2, %v571_v19, 0.0 }
  0xea   : > { %v565_v14 = vrot.slane %v564_v2, 1 }
  0xec   : > { %v566_v16 = vadd.f32 %v565_v14, %v564_v2 }
  0xee   : > { %860 = vpush %v566_v16 }
 0x117   : > { %s857_s24 = spop %856 }
 0x118   : > { %v574_v20 = vstv %s857_s24  ;;  %s859_s0 = spop %858 }
 0x119   : > { %v575_v21 = vsel %vm573_vm0, %v574_v20, 0.0  ;;  %v578_v3 = vstv %s859_s0 }
 0x11a   : > { %v576_v7 = vadd.f32 %v575_v21, %v572_v22  ;;  %v579_v23 = vsel %vm577_vm9, %v578_v3, 0.0 }
 0x11c   : > { %v580_v24 = vadd.f32 %v579_v23, %v576_v7 }
 0x11f   : > { %s861_s16 = spop %860 }
 0x120   : > { %v582_v25 = vstv %s861_s16 }
 0x121   : > { %v583_v26 = vsel %vm581_vm10, %v582_v25, 0.0 }
 0x122   : > { %v584_v28 = vadd.f32 %v583_v26, %v580_v24 }
 0x124   : > { %585 = vst [vmem:[%s330_s13] sm:$0x1] %v584_v28 }
 0x125   : > { %1111 = shalt.err (!%p1108_p2)
}
 0x126   : > { %868 = dma.vmem_to_hbm [thread:$0]  (%p1269_p9), %s647_s14, 16, %s649_s18, %s1538_s15  }
 0x127 PF: > { %s660_s26 = sand.u32 1, %s1154_s20   ;;  %p880_p3 = pnand %p824_p12, %p1278_p11 }
 0x128   : > { %s661_s30 = scalar_lea.sflag [#allocation5], %s660_s26 }
 0x129   : > { %p881_p4 = pneg %p880_p3 }
 0x12b   : > { %1145 = dma.done.wait (%p881_p4), %s661_s30, 256  }
 0x12c   : > { %1147 = vsyncadd (%p881_p4), %s661_s30, 4294967040  ;;  %s1629_s6 = sadd.s32 4294967294, %s1174_s25  }
 0x12d   : > { %s670_s24 = sand.u32 1, %s1629_s6  }
 0x12e   : > { %s671_s0 = scalar_lea.sflag [#allocation10], %s670_s24 }
 0x12f   : > { %1149 = dma.done.wait (%p881_p4), %s671_s0, 272  }
 0x130   : > { %1151 = vsyncadd (%p881_p4), %s671_s0, 4294967024  ;;  %s29_s25 = sadd.s32 1, %s1174_s25   ;;  %s1630_s23 = sld [smem:[#allocation16_spill]] }
 0x131   : > { %p26_p9 = scmp.ge.s32.totalorder %s29_s25, 4   ;;  %s1631_s24 = sld [smem:[#allocation17_spill]] }
 0x132   : > { %s1632_s20 = smov %s1158_s21  ;;  %s1633_s21 = smov %s1162_s22 }
 0x133   : > { %s1634_s22 = smov %s1276_s8  ;;  %28 = sbr.rel (!%p26_p9) target bundleno = 13 (0xd), region = 122 }
 0x138   :  { %686 = vsyncpa [#allocation4], 1 }
 0x139   :  { %688 = vsyncpa [#allocation4 + $0x1], 1 }
 0x13a   :  { %689 = vsyncpa [#allocation7], 1 }
 0x13b   :  { %691 = vsyncpa [#allocation7 + $0x1], 1 }
 0x13c   :  { %692 = vsyncpa [#allocation5], 1 }
 0x13d   :  { %694 = vsyncpa [#allocation5 + $0x1], 1 }
 0x13e   :  { %695 = vsyncpa [#allocation10], 1 }
 0x13f   :  { %697 = vsyncpa [#allocation10 + $0x1], 1 }

</bundles_post_ra>
